<compile_context>
chip_gen: v5e
topology: v5e:2x2
jax: 0.10.0
libtpu: 0.0.40
codegen_flags: <defaults>
</compile_context>

<pallas_src>
import jax
import jax.numpy as jnp
from jax.experimental import pallas as pl
from jax.experimental.pallas import tpu as pltpu


# --------------------------------------------------------------------------- #
# Kernel
# --------------------------------------------------------------------------- #
def _rope_kernel(cos_ref, sin_nxt_ref, sin_prv_ref, xq_ref, xk_ref, oq_ref, ok_ref):
    """Fused interleaved-RoPE for one (row-tile, col-tile) block of xq and xk.

    Data refs are 2-D [rows, S*D] views (lane-dense last dim).  Per-column
    tables (in the compute dtype):
        cos[j]     : pair-duplicated cos
        sin_nxt[j] : -sin at even lanes, 0 at odd lanes   (multiplies x[j+1])
        sin_prv[j] : +sin at odd lanes,  0 at even lanes  (multiplies x[j-1])
    so   out[j] = x[j]*cos[j] + x[j+1]*sin_nxt[j] + x[j-1]*sin_prv[j]
    which is exactly the torch view_as_complex rotary on adjacent (even, odd)
    pairs.
    """
    tl = cos_ref.shape[-1]
    cos = cos_ref[...]          # (1, TL)
    sin_nxt = sin_nxt_ref[...]  # (1, TL)
    sin_prv = sin_prv_ref[...]  # (1, TL)
    cdtype = cos.dtype          # compute dtype == table dtype

    # JAX does not CSE broadcast_in_dim, so emit the sublane broadcast of the
    # tables once per distinct row count (shared by the q and k paths whenever
    # their row tiles match, i.e. n_heads == n_kv_heads).
    bcast_cache = {}

    def tables_for(rows):
        if rows not in bcast_cache:
            bcast_cache[rows] = (
                jnp.broadcast_to(cos, (rows, tl)),
                jnp.broadcast_to(sin_nxt, (rows, tl)),
                jnp.broadcast_to(sin_prv, (rows, tl)),
            )
        return bcast_cache[rows]

    def rope(x_ref, o_ref):
        rows = x_ref.shape[0]
        cos_b, sn_b, sp_b = tables_for(rows)
        x = x_ref[...].astype(cdtype)
        # Neighbour lanes via XLU rotates (free vector-extended slot; no large
        # VMEM temporaries).  pltpu.roll follows the np.roll convention
        # (out[i] = x[(i - shift) % n]); shifts kept positive for maximal
        # lowering compatibility: tl-1 is equivalent to -1.
        nxt = pltpu.roll(x, shift=tl - 1, axis=1)   # nxt[j] = x[j + 1]
        prv = pltpu.roll(x, shift=1, axis=1)        # prv[j] = x[j - 1]
        # The circularly wrapped lanes at the tile edges hit zero table entries
        # (tl is always even), so they never contribute.
        o_ref[...] = (x * cos_b + nxt * sn_b + prv * sp_b).astype(o_ref.dtype)

    rope(xq_ref, oq_ref)
    rope(xk_ref, ok_ref)


# --------------------------------------------------------------------------- #
# Tables (precompute once per model — they depend only on freqs_cis)
# --------------------------------------------------------------------------- #
def make_rotary_tables(freqs_cis, compute_dtype=jnp.float32):
    """Build the three flat [1, S*D] rotation tables from complex freqs_cis."""
    S, half = freqs_cis.shape
    D = 2 * half
    cos = jnp.real(freqs_cis).astype(jnp.float32)       # [S, D//2]
    sin = jnp.imag(freqs_cis).astype(jnp.float32)       # [S, D//2]
    zero = jnp.zeros_like(sin)
    cols = S * D
    cos_t = jnp.stack([cos, cos], axis=-1).reshape(1, cols)        # cos at every lane
    sin_nxt_t = jnp.stack([-sin, zero], axis=-1).reshape(1, cols)  # -sin @ even lanes
    sin_prv_t = jnp.stack([zero, sin], axis=-1).reshape(1, cols)   # +sin @ odd lanes
    dt = jnp.dtype(compute_dtype)
    return (cos_t.astype(dt), sin_nxt_t.astype(dt), sin_prv_t.astype(dt))


# --------------------------------------------------------------------------- #
# Tiling helpers
# --------------------------------------------------------------------------- #
def _vmem_limit_bytes():
    """Scoped VMEM budget derived from the chip (96 MiB on v5e/v6e, 48 on v7x)."""
    try:
        phys = int(pltpu.get_tpu_info().vmem_capacity_bytes)
    except Exception:
        phys = 64 << 20   # conservative fallback: v7x has 64 MiB per TensorCore
    return min(96 << 20, (phys * 3) // 4)


def _pick_tile(total: int, target: int, multiple: int) -> int:
    """Largest t <= target with t % multiple == 0 and total % t == 0; falls back
    to the smallest aligned divisor above target, else the full extent."""
    if total <= target:
        return total
    t = (min(target, total) // multiple) * multiple
    while t >= multiple:
        if total % t == 0:
            return t
        t -= multiple
    t = ((target + multiple - 1) // multiple) * multiple
    for cand in range(t, min(total, t + 1024 * multiple), multiple):
        if total % cand == 0:
            return cand
    return total


def _ensure_two_grid_steps(tr_k, tl, rows_k, cols, row_mult):
    """v7x has 2 TensorCores; a 'parallel' grid axis needs >= 2 steps to shard."""
    if (rows_k // tr_k) * (cols // tl) >= 2:
        return tr_k, tl
    if tr_k % (2 * row_mult) == 0:          # split rows (keeps sublane multiple)
        return tr_k // 2, tl
    if tl % 256 == 0:                       # split columns (keeps 128-lane multiple)
        return tr_k, tl // 2
    return tr_k, tl                         # tiny problem; leave as-is


# --------------------------------------------------------------------------- #
# Wrapper
# --------------------------------------------------------------------------- #
def llama_rotary_forward(xq, xk, freqs_cis=None, *, tables=None,
                         compute_dtype=jnp.float32):
    """Matches PytorchLlamaRotaryModel.forward.

    xq: [B, n_heads, S, D], xk: [B, n_kv_heads, S, D],
    freqs_cis: complex64 [S, D//2] (or pass precomputed `tables=`).
    Returns (xq_out, xk_out) with the same shapes/dtypes as the inputs.
    """
    B, H, S, D = xq.shape
    Bk, Hk, Sk, Dk = xk.shape
    assert (Bk, Sk, Dk) == (B, S, D)
    assert D % 2 == 0 and H % Hk == 0
    g = H // Hk
    rows_q, rows_k, cols = B * H, B * Hk, S * D

    if tables is None:
        tables = make_rotary_tables(freqs_cis, compute_dtype=compute_dtype)
    cos_t, sin_nxt_t, sin_prv_t = tables
    assert cos_t.shape == (1, cols)
    tab_isz = jnp.dtype(cos_t.dtype).itemsize     # compute happens in table dtype

    # ---- lane-dense 2-D views (free reshapes of contiguous trailing dims) ----
    xq2 = xq.reshape(rows_q, cols)
    xk2 = xk.reshape(rows_k, cols)

    # ---- tile selection (dtype-aware, VMEM-budget-derived) -------------------
    itemsize = jnp.dtype(xq.dtype).itemsize
    vmem_limit = _vmem_limit_bytes()

    # Rows: native sublane packing for the dtype; cap so tr_q = g*tr_k <= ~256.
    row_mult = {4: 8, 2: 16, 1: 32}.get(itemsize, 8)
    row_target = max(row_mult, 256 // g)
    tr_k = _pick_tile(rows_k, row_target, row_mult)
    tr_q = g * tr_k

    # Columns: biggest lane-dense tile whose double-buffered pipeline blocks
    # plus in-body temporaries (rolls, broadcasts, products) fit in ~half of
    # the scoped-VMEM budget.
    per_col_pipeline = 2 * 2 * (tr_q + tr_k) * itemsize + 2 * 3 * tab_isz
    per_col_body = 12 * tr_q * tab_isz
    target_cols = (vmem_limit // 2) // (per_col_pipeline + per_col_body)
    target_cols = max(128, (target_cols // 128) * 128)
    tl = _pick_tile(cols, target_cols, 128)

    # v7x megacore: make sure both TensorCores get work.
    tr_k, tl = _ensure_two_grid_steps(tr_k, tl, rows_k, cols, row_mult)
    tr_q = g * tr_k
    grid = (rows_k // tr_k, cols // tl)

    table_spec = pl.BlockSpec((1, tl), lambda r, c: (0, c))
    q_spec = pl.BlockSpec((tr_q, tl), lambda r, c: (r, c))
    k_spec = pl.BlockSpec((tr_k, tl), lambda r, c: (r, c))

    oq2, ok2 = pl.pallas_call(
        _rope_kernel,
        out_shape=(jax.ShapeDtypeStruct((rows_q, cols), xq.dtype),
                   jax.ShapeDtypeStruct((rows_k, cols), xk.dtype)),
        grid_spec=pltpu.PrefetchScalarGridSpec(
            num_scalar_prefetch=0,
            grid=grid,
            in_specs=[table_spec, table_spec, table_spec, q_spec, k_spec],
            out_specs=[q_spec, k_spec],
        ),
        compiler_params=pltpu.CompilerParams(
            dimension_semantics=("parallel", "parallel"),
            vmem_limit_bytes=vmem_limit,
        ),
    )(cos_t, sin_nxt_t, sin_prv_t, xq2, xk2)

    return oq2.reshape(B, H, S, D), ok2.reshape(B, Hk, S, D)


# --------------------------------------------------------------------------- #
# Pure-JAX reference (complex multiply, torch view_as_complex convention)
# --------------------------------------------------------------------------- #
def _ref_apply_rotary(x, freqs_cis):
    B, H, S, D = x.shape
    xf = x.astype(jnp.float32).reshape(B, H, S, D // 2, 2)
    xc = jax.lax.complex(xf[..., 0], xf[..., 1])             # [B,H,S,D/2]
    out = xc * freqs_cis[None, None, :, :]
    out = jnp.stack([jnp.real(out), jnp.imag(out)], axis=-1).reshape(B, H, S, D)
    return out.astype(x.dtype)


def _precompute_freqs_cis(head_dim, seq_len, theta=10000.0):
    freqs = 1.0 / (theta ** (jnp.arange(0, head_dim, 2, dtype=jnp.float32) / head_dim))
    t = jnp.arange(seq_len, dtype=jnp.float32)
    angles = jnp.outer(t, freqs)                              # [S, D/2]
    return jnp.exp(1j * angles.astype(jnp.complex64))         # complex64 [S, D/2]


if __name__ == "__main__":
    # Small Llama-like config: batch=2, n_heads=8, n_kv_heads=4, seq=8, head_dim=64
    batch, n_heads, n_kv_heads, seq_len, head_dim = 2, 8, 4, 8, 64

    key = jax.random.PRNGKey(0)
    kq, kk = jax.random.split(key)
    xq = jax.random.normal(kq, (batch, n_heads, seq_len, head_dim), dtype=jnp.float32)
    xk = jax.random.normal(kk, (batch, n_kv_heads, seq_len, head_dim), dtype=jnp.float32)
    freqs_cis = _precompute_freqs_cis(head_dim, seq_len)

    # Rotation tables depend only on freqs_cis: build once per model, reuse.
    tables = make_rotary_tables(freqs_cis)

    xq_out, xk_out = llama_rotary_forward(xq, xk, tables=tables)
    jax.block_until_ready((xq_out, xk_out))

    # Correctness check against the pure-JAX (complex-multiply) reference.
    xq_ref = _ref_apply_rotary(xq, freqs_cis)
    xk_ref = _ref_apply_rotary(xk, freqs_cis)
    assert xq_out.shape == xq.shape and xk_out.shape == xk.shape
    assert jnp.allclose(xq_out, xq_ref, atol=1e-5, rtol=1e-5)
    assert jnp.allclose(xk_out, xk_ref, atol=1e-5, rtol=1e-5)

    print("KERNEL_OK")
</pallas_src>

<mosaic_0001>
module attributes {stable_mosaic.version = 11 : i64} {
  func.func @_rope_kernel(%arg0: i32, %arg1: i32, %arg2: memref<1x256xf32, #tpu.memory_space<vmem>>, %arg3: memref<1x256xf32, #tpu.memory_space<vmem>>, %arg4: memref<1x256xf32, #tpu.memory_space<vmem>>, %arg5: memref<16x256xf32, #tpu.memory_space<vmem>>, %arg6: memref<8x256xf32, #tpu.memory_space<vmem>>, %arg7: memref<16x256xf32, #tpu.memory_space<vmem>>, %arg8: memref<8x256xf32, #tpu.memory_space<vmem>>) attributes {dimension_semantics = [#tpu.dimension_semantics<parallel>, #tpu.dimension_semantics<parallel>], iteration_bounds = array<i64: 1, 2>, scalar_prefetch = 0 : i64, scratch_operands = 0 : i64, tpu.core_type = #tpu.core_type<tc>, window_params = [{transform_indices = @transform_0, window_bounds = array<i64: 1, 256>}, {transform_indices = @transform_1, window_bounds = array<i64: 1, 256>}, {transform_indices = @transform_2, window_bounds = array<i64: 1, 256>}, {transform_indices = @transform_3, window_bounds = array<i64: 16, 256>}, {transform_indices = @transform_4, window_bounds = array<i64: 8, 256>}, {transform_indices = @transform_5, window_bounds = array<i64: 16, 256>}, {transform_indices = @transform_6, window_bounds = array<i64: 8, 256>}]} {
    %c0 = arith.constant 0 : index
    %c0_0 = arith.constant 0 : index
    %0 = vector.load %arg2[%c0, %c0_0] : memref<1x256xf32, #tpu.memory_space<vmem>>, vector<1x256xf32>
    %c0_1 = arith.constant 0 : index
    %c0_2 = arith.constant 0 : index
    %1 = vector.load %arg3[%c0_1, %c0_2] : memref<1x256xf32, #tpu.memory_space<vmem>>, vector<1x256xf32>
    %c0_3 = arith.constant 0 : index
    %c0_4 = arith.constant 0 : index
    %2 = vector.load %arg4[%c0_3, %c0_4] : memref<1x256xf32, #tpu.memory_space<vmem>>, vector<1x256xf32>
    %3 = vector.shape_cast %0 : vector<1x256xf32> to vector<1x256xf32>
    %4 = vector.broadcast %3 : vector<1x256xf32> to vector<16x256xf32>
    %5 = vector.shape_cast %1 : vector<1x256xf32> to vector<1x256xf32>
    %6 = vector.broadcast %5 : vector<1x256xf32> to vector<16x256xf32>
    %7 = vector.shape_cast %2 : vector<1x256xf32> to vector<1x256xf32>
    %8 = vector.broadcast %7 : vector<1x256xf32> to vector<16x256xf32>
    %c0_5 = arith.constant 0 : index
    %c0_6 = arith.constant 0 : index
    %9 = vector.load %arg5[%c0_5, %c0_6] : memref<16x256xf32, #tpu.memory_space<vmem>>, vector<16x256xf32>
    %c255_i32 = arith.constant 255 : i32
    %10 = tpu.dynamic_rotate %9 by %c255_i32 dim 1 : vector<16x256xf32>, i32 -> vector<16x256xf32>
    %c1_i32 = arith.constant 1 : i32
    %11 = tpu.dynamic_rotate %9 by %c1_i32 dim 1 : vector<16x256xf32>, i32 -> vector<16x256xf32>
    %12 = arith.mulf %9, %4 : vector<16x256xf32>
    %13 = arith.mulf %10, %6 : vector<16x256xf32>
    %14 = arith.addf %12, %13 : vector<16x256xf32>
    %15 = arith.mulf %11, %8 : vector<16x256xf32>
    %16 = arith.addf %14, %15 : vector<16x256xf32>
    %c0_7 = arith.constant 0 : index
    %c0_8 = arith.constant 0 : index
    %17 = vector.load %arg7[%c0_7, %c0_8] : memref<16x256xf32, #tpu.memory_space<vmem>>, vector<16x256xf32>
    tpu.vector_store %arg7[%c0_7, %c0_8], %16 {strides = array<i32>} : memref<16x256xf32, #tpu.memory_space<vmem>>, vector<16x256xf32>,
    %18 = vector.shape_cast %0 : vector<1x256xf32> to vector<1x256xf32>
    %19 = vector.broadcast %18 : vector<1x256xf32> to vector<8x256xf32>
    %20 = vector.shape_cast %1 : vector<1x256xf32> to vector<1x256xf32>
    %21 = vector.broadcast %20 : vector<1x256xf32> to vector<8x256xf32>
    %22 = vector.shape_cast %2 : vector<1x256xf32> to vector<1x256xf32>
    %23 = vector.broadcast %22 : vector<1x256xf32> to vector<8x256xf32>
    %c0_9 = arith.constant 0 : index
    %c0_10 = arith.constant 0 : index
    %24 = vector.load %arg6[%c0_9, %c0_10] : memref<8x256xf32, #tpu.memory_space<vmem>>, vector<8x256xf32>
    %c255_i32_11 = arith.constant 255 : i32
    %25 = tpu.dynamic_rotate %24 by %c255_i32_11 dim 1 : vector<8x256xf32>, i32 -> vector<8x256xf32>
    %c1_i32_12 = arith.constant 1 : i32
    %26 = tpu.dynamic_rotate %24 by %c1_i32_12 dim 1 : vector<8x256xf32>, i32 -> vector<8x256xf32>
    %27 = arith.mulf %24, %19 : vector<8x256xf32>
    %28 = arith.mulf %25, %21 : vector<8x256xf32>
    %29 = arith.addf %27, %28 : vector<8x256xf32>
    %30 = arith.mulf %26, %23 : vector<8x256xf32>
    %31 = arith.addf %29, %30 : vector<8x256xf32>
    %c0_13 = arith.constant 0 : index
    %c0_14 = arith.constant 0 : index
    %32 = vector.load %arg8[%c0_13, %c0_14] : memref<8x256xf32, #tpu.memory_space<vmem>>, vector<8x256xf32>
    tpu.vector_store %arg8[%c0_13, %c0_14], %31 {strides = array<i32>} : memref<8x256xf32, #tpu.memory_space<vmem>>, vector<8x256xf32>,
    return
  }
  func.func @transform_0(%arg0: i32, %arg1: i32) -> (i32, i32) {
    %c0_i32 = arith.constant 0 : i32
    %c0_i32_0 = arith.constant 0 : i32
    return %c0_i32, %arg1 : i32, i32
  }
  func.func @transform_1(%arg0: i32, %arg1: i32) -> (i32, i32) {
    %c0_i32 = arith.constant 0 : i32
    %c0_i32_0 = arith.constant 0 : i32
    return %c0_i32, %arg1 : i32, i32
  }
  func.func @transform_2(%arg0: i32, %arg1: i32) -> (i32, i32) {
    %c0_i32 = arith.constant 0 : i32
    %c0_i32_0 = arith.constant 0 : i32
    return %c0_i32, %arg1 : i32, i32
  }
  func.func @transform_3(%arg0: i32, %arg1: i32) -> (i32, i32) {
    %c0_i32 = arith.constant 0 : i32
    return %arg0, %arg1 : i32, i32
  }
  func.func @transform_4(%arg0: i32, %arg1: i32) -> (i32, i32) {
    %c0_i32 = arith.constant 0 : i32
    return %arg0, %arg1 : i32, i32
  }
  func.func @transform_5(%arg0: i32, %arg1: i32) -> (i32, i32) {
    %c0_i32 = arith.constant 0 : i32
    return %arg0, %arg1 : i32, i32
  }
  func.func @transform_6(%arg0: i32, %arg1: i32) -> (i32, i32) {
    %c0_i32 = arith.constant 0 : i32
    return %arg0, %arg1 : i32, i32
  }
}

</mosaic_0001>

<bundles_post_ra>
// kernel: tpu_custom_call.1
= control target key start
LH: loop header
LB: loop body
LE: loop exit
PB: predicated region body
PF: predicated region fallthrough
CT: control target
= control target key end

     0   :  { %s1542_s0 = inlined_call_operand.hbm [shape: f32[1,512], index: 0, kind: input, shape index: {}]   ;;  %s1543_s1 = inlined_call_operand.hbm [shape: f32[1,512], index: 1, kind: input, shape index: {}]   ;;  %s1544_s2 = inlined_call_operand.hbm [shape: f32[1,512], index: 2, kind: input, shape index: {}]   ;;  %s1545_s3 = inlined_call_operand.hbm [shape: f32[16,512], index: 3, kind: input, shape index: {}]   ;;  %s1546_s4 = inlined_call_operand.hbm [shape: f32[8,512], index: 4, kind: input, shape index: {}]   ;;  %s1547_s5 = inlined_call_operand.hbm [shape: f32[16,512], index: 5, kind: output, shape index: {0}]   ;;  %s1548_s6 = inlined_call_operand.hbm [shape: f32[8,512], index: 6, kind: output, shape index: {1}]  }
   0x1   :  { %1559 = sst [smem:[#allocation26_spill]] %s1543_s1 }
   0x2   :  { %1560 = sst [smem:[#allocation27_spill]] %s1545_s3 }
   0x3   :  { %1561 = sst [smem:[#allocation28_spill]] %s1547_s5 }
   0x4   :  { %12 = vsyncpa [#allocation3], 0 }
   0x5   :  { %14 = vsyncpa [#allocation3 + $0x1], 0 }
   0x6   :  { %15 = vsyncpa [#allocation6], 0 }
   0x7   :  { %17 = vsyncpa [#allocation6 + $0x1], 0 }
   0x8   :  { %18 = vsyncpa [#allocation9], 0 }
   0x9   :  { %20 = vsyncpa [#allocation9 + $0x1], 0 }
   0xa   :  { %21 = vsyncpa [#allocation4], 0 }
   0xb   :  { %23 = vsyncpa [#allocation4 + $0x1], 0 }
   0xc   :  { %24 = vsyncpa [#allocation13], 0 }
   0xd   :  { %26 = vsyncpa [#allocation13 + $0x1], 0  ;;  %s1269_s21 = smov 0   ;;  %s1271_s22 = smov 0  }
   0xe   :  { %s1273_s23 = smov 0   ;;  %s1275_s24 = smov 0  }
   0xf   :  { %s1277_s25 = smov 0   ;;  %s1279_s26 = smov 0  }
  0x10 LB: > { %1562 = sst [smem:[#allocation19_spill]] %s1204_s21  ;;  %s1300_s27 = sadd.s32 4294967295, %s1224_s26   ;;  %s1224_s26 = sphi %s1279_s26, %s32_s26   ;;  %s1220_s25 = sphi %s1277_s25, %s1589_s25   ;;  %s1216_s24 = sphi %s1275_s24, %s1588_s24   ;;  %s1212_s23 = sphi %s1273_s23, %s1584_s23   ;;  %s1208_s22 = sphi %s1271_s22, %s1587_s22   ;;  %s1204_s21 = sphi %s1269_s21, %s1586_s21  }
  0x11   : > { %1563 = sst [smem:[#allocation20_spill]] %s1212_s23  ;;  %s822_s28 = sadd.s32 4294967294, %s1224_s26  }
  0x12   : > { %1564 = sst [smem:[#allocation21_spill]] %s1224_s26  ;;  %s41_s29 = sadd.s32 1, %s1220_s25 }
  0x13   : > { %s51_s30 = sadd.s32 1, %s1212_s23  ;;  %p42_p0 = scmp.ge.s32.totalorder %s41_s29, 2 }
  0x14   : > { %p58_p1 = scmp.ne.s32.totalorder %s1212_s23, %s1208_s22  ;;  %p59_p2 = scmp.eq.s32.totalorder %s1224_s26, 0 }
  0x15   : > { %p64_p3 = scmp.ne.s32.totalorder %s1208_s22, %s1204_s21  ;;  %s1591_s29 = smov (%p42_p0, %s41_s29), 0 }
  0x16   : > { %1565 = sst [smem:[#allocation22_spill]] %s1591_s29  ;;  %p1312_p4 = por %p59_p2, %p58_p1 }
  0x17   : > { %p65_p5 = scmp.eq.s32.totalorder %s1300_s27, 0  ;;  %s48_s8 = ssub.s32 %s1220_s25, %s1591_s29 }
  0x18   : > { %p198_p6 = scmp.eq.s32.totalorder %s1300_s27, 1  ;;  %p49_p7 = scmp.eq.s32.totalorder %s48_s8, 0 }
  0x19   : > { %p1320_p8 = por %p65_p5, %p64_p3  ;;  %p204_p10 = scmp.eq.s32.totalorder %s822_s28, 1 }
  0x1a   : > { %p1324_p9 = por %p198_p6, %p58_p1  ;;  %p824_p12 = scmp.ge.s32.totalorder %s1224_s26, 2 }
  0x1b   : > { %s1329_s11 = scalar_select %p49_p7, %s1212_s23, %s51_s30  }
  0x1c   : > { %s1568_s10 = scalar_select %p1324_p9, 1, 0 }
  0x1d   : > { %1570 = sst [smem:[#allocation24_spill]] %s1329_s11  ;;  %p1331_p11 = por %p204_p10, %p64_p3 }
  0x1e   : > { %1569 = sst [smem:[#allocation23_spill]] %s1568_s10  ;;  %p894_p13 = scmp.lt.s32.totalorder %s1224_s26, 2 }
  0x1f   : > { %s1571_s12 = scalar_select %p1331_p11, 1, 0 }
  0x20   : > { %s1338_s13 = sand.u32 1, %s1212_s23   ;;  %s1344_s15 = sshll.u32 %s1220_s25, 1 }
  0x21   : > { %1572 = sst [smem:[#allocation25_spill]] %s1571_s12  ;;  %s1341_s14 = sshll.u32 %s1338_s13, 1 }
  0x22   : > { %p1348_p0 = pnand %p894_p13, %p1312_p4  ;;  %s271_s17 = sand.u32 1, %s1224_s26  }
  0x23   : > { %s1574_s1 = sld [smem:[#allocation26_spill]]  ;;  %s275_s30 = scalar_lea.vmem [#allocation5], %s1341_s14 }
  0x24   : > { %s283_s8 = sshll.u32 %s275_s30, 4  ;;  %s1358_s29 = scalar_lea.sflag [#allocation6], %s271_s17  ;;  %s284_s8 = int_to_ptr.vmem [resolvable:$true] %s283_s8 }
  0x25   : > { %p837_p1 = scmp.ge.s32.totalorder %s1224_s26, 1  ;;  %p354_p2 = scmp.lt.s32.totalorder %s1224_s26, 3 }
  0x26   : > { %s831_s7 = sshll.u32 %s1338_s13, 5  ;;  %s1557_s11 = sshll.u32 %s1220_s25, 4 }
  0x27   : > { %p1367_p3 = pnand %p837_p1, %p354_p2  ;;  %s1576_s3 = sld [smem:[#allocation27_spill]] }
  0x28   : > { %s313_s23 = scalar_lea.vmem [#allocation8], %s831_s7  ;;  %s1226_s26 = smov 512  }
  0x29   : > { %s279_s20 = scalar_lea.hbm %s1574_s1, %s1344_s15  ;;  %s1227_s12 = smov 256  }
  0x2a   : > { %s281_s28 = sshll.u32 %s279_s20, 4  ;;  %s1228_s21 = smov 16   ;;  %s282_s28 = int_to_ptr.hbm [resolvable:$true] %s281_s28 }
  0x2b   : > { %877 = dma.hbm_to_vmem [thread:$0]  (!%p1348_p0), %s282_s28, 32, %s284_s8, %s1358_s29  }
  0x2c   : > { %s324_s28 = sshll.u32 %s313_s23, 4  ;;  %s310_s8 = scalar_lea.sflag [#allocation9], %s271_s17  ;;  %s325_s28 = int_to_ptr.vmem [resolvable:$true] %s324_s28 }
  0x2d   : > { %s321_s30 = scalar_lea.hbm %s1576_s3, %s1557_s11  ;;  %s260_s20 = scalar_lea.hbm %s1542_s0, %s1344_s15 }
  0x2e   : > { %s322_s1 = sshll.u32 %s321_s30, 4  ;;  %s262_s7 = sshll.u32 %s260_s20, 4  ;;  %s323_s1 = int_to_ptr.hbm [resolvable:$true] %s322_s1  ;;  %s263_s7 = int_to_ptr.hbm [resolvable:$true] %s262_s7 }
  0x2f   : > { %883 = dma.hbm_to_vmem [thread:$0]  (!%p1348_p0), %s323_s1, 512, %s325_s28, %s310_s8, %s1226_s26, %s1227_s12, %s1228_s21  }
  0x30   : > { %s256_s23 = scalar_lea.vmem [#allocation2], %s1341_s14  ;;  %s253_s11 = scalar_lea.sflag [#allocation3], %s1338_s13 }
  0x31   : > { %s264_s30 = sshll.u32 %s256_s23, 4  ;;  %s298_s5 = scalar_lea.hbm %s1544_s2, %s1344_s15  ;;  %s265_s30 = int_to_ptr.vmem [resolvable:$true] %s264_s30 }
  0x32   : > { %874 = dma.hbm_to_vmem [thread:$0]  (!%p1348_p0), %s263_s7, 32, %s265_s30, %s253_s11  }
  0x33   : > { %s300_s1 = sshll.u32 %s298_s5, 4  ;;  %s294_s21 = scalar_lea.vmem [#allocation7], %s1341_s14  ;;  %s301_s1 = int_to_ptr.hbm [resolvable:$true] %s300_s1 }
  0x34   : > { %s302_s26 = sshll.u32 %s294_s21, 4  ;;  %s834_s10 = sshll.u32 %s1338_s13, 4  ;;  %s303_s26 = int_to_ptr.vmem [resolvable:$true] %s302_s26 }
  0x35   : > { %880 = dma.hbm_to_vmem [thread:$0]  (!%p1348_p0), %s301_s1, 32, %s303_s26, %s1358_s29  }
  0x36   : > { %s1577_s12 = sshll.u32 %s1220_s25, 4  ;;  %s338_s11 = scalar_lea.vmem [#allocation10], %s834_s10 }
  0x37   : > { %s345_s20 = scalar_lea.hbm %s1546_s4, %s1577_s12  ;;  %s349_s7 = sshll.u32 %s338_s11, 4  ;;  %s350_s7 = int_to_ptr.vmem [resolvable:$true] %s349_s7 }
  0x38   : > { %s347_s23 = sshll.u32 %s345_s20, 4  ;;  %358 = sbr.rel (%p1367_p3) target bundleno = 232 (0xe8), region = 40  ;;  %s348_s23 = int_to_ptr.hbm [resolvable:$true] %s347_s23 }
  0x39   : > { %886 = dma.hbm_to_vmem [thread:$0]  (!%p1348_p0), %s348_s23, 256, %s350_s7, %s310_s8  }
  0x3a   : > { %s1405_s3 = sand.u32 (!%p1367_p3), 1, %s1208_s22  }
  0x3b   : > { %s1408_s5 = sshll.u32 (!%p1367_p3), %s1405_s3, 1  ;;  %s361_s29 = scalar_lea.sflag (!%p1367_p3), [#allocation3], %s1405_s3 }
  0x3c   : > { %s364_s13 = scalar_lea.vmem (!%p1367_p3), [#allocation2], %s1408_s5 }
  0x3d   : > { %1183 = dma.done.wait (%p1320_p8), %s361_s29, 32  }
  0x3e   : > { %1185 = vsyncadd (%p1320_p8), %s361_s29, 4294967264  ;;  %s370_s14 = sand.u32 1, %s1300_s27   ;;  %s374_s16 = scalar_lea.vmem [#allocation5], %s1408_s5 }
  0x3f   : > { %s371_s15 = scalar_lea.sflag [#allocation6], %s370_s14 }
  0x40   : > { %1187 = dma.done.wait (%p1320_p8), %s371_s15, 64  }
  0x41   : > { %1189 = vsyncadd (%p1320_p8), %s371_s15, 4294967232  ;;  %s841_s18 = sshll.u32 %s1405_s3, 5  ;;  %s384_s8 = scalar_lea.vmem [#allocation7], %s1408_s5 }
  0x42   : > { %s391_s30 = scalar_lea.sflag [#allocation9], %s370_s14  ;;  %s394_s17 = scalar_lea.vmem [#allocation8], %s841_s18 }
  0x43   : > { %1191 = dma.done.wait (%p1320_p8), %s391_s30, 768  }
  0x44   : > { %1193 = vsyncadd (%p1320_p8), %s391_s30, 4294966528  ;;  %s842_s27 = sshll.u32 %s1405_s3, 4  ;;  %v487_v0 = vld [vmem:[%s394_s17 + $0x8] sm:$0xff]  ;;  %v486_v1 = vld [vmem:[%s394_s17] sm:$0xff]  ;;  %s1229_s1 = smov 127   ;;  %v498_v7 = vlaneseq }
  0x45   : > { %494 = vrot.lane.b32.xlu1 %v487_v0, %s1229_s1  ;;  %490 = vrot.lane.b32.xlu0 %v486_v1, %s1229_s1  ;;  %s404_s21 = scalar_lea.vmem [#allocation10], %s842_s27  ;;  %v1433_v3 = vld [vmem:[%s394_s17 + $0x18] sm:$0xff]  ;;  %v488_v4 = vld [vmem:[%s394_s17 + $0x10] sm:$0xff]  ;;  %s1230_s9 = smov 1  }
  0x46   : > { %v542_v2 = vld [vmem:[%s404_s21] sm:$0xff]  ;;  %v543_v5 = vld [vmem:[%s404_s21 + $0x8] sm:$0xff]  ;;  %v1437_v10 = vand.u32 127, %v498_v7  ;;  %s855_s26 = sshll.u32 %s1216_s24, 4  ;;  %s1466_s10 = scalar_lea.vmem [#allocation11], %s841_s18 }
  0x47   : > { %544 = vrot.lane.b32.xlu2 %v542_v2, %s1229_s1  ;;  %v468_v12 = vld [vmem:[%s364_s13] sm:$0x3]  ;;  %v469_v13 = vld [vmem:[%s374_s16] sm:$0x3]  ;;  %v470_v22 = vld [vmem:[%s384_s8] sm:$0x3]  ;;  %s607_s19 = scalar_lea.hbm %s1548_s6, %s855_s26 }
  0x48   : > { %vm500_vm0 = vcmp.lt.s32.totalorder %v1437_v10, 127  ;;  %v473_v16 = vperm.slane %v468_v12, 1  ;;  %v472_v17 = vperm.slane %v468_v12, 0  ;;  %v477_v18 = vperm.slane %v469_v13, 0  ;;  %s458_s20 = scalar_lea.vmem [#allocation12], %s842_s27  ;;  %s1578_s7 = sld [smem:[#allocation28_spill]] }
  0x49   : > { %v478_v19 = vperm.slane %v469_v13, 1  ;;  %vm513_vm1 = vcmp.lt.s32.totalorder %v1437_v10, 1  ;;  %v482_v28 = vperm.slane %v470_v22, 0  ;;  %v483_v29 = vperm.slane %v470_v22, 1  ;;  %s609_s23 = sshll.u32 %s458_s20, 4  ;;  %s589_s29 = sshll.u32 %s1466_s10, 4  ;;  %s610_s23 = int_to_ptr.vmem [resolvable:$true] %s609_s23  ;;  %s1488_s29 = int_to_ptr.vmem [resolvable:$true] %s589_s29 }
  0x4a   : > { %v519_v24 = vmul.f32 %v487_v0, %v473_v16  ;;  %v518_v25 = vmul.f32 %v486_v1, %v472_v17  ;;  %v520_v34 = vmul.f32 %v488_v4, %v472_v17  ;;  %v556_v42 = vmul.f32 %v542_v2, %v472_v17  ;;  %s611_s13 = sshll.u32 %s607_s19, 4  ;;  %s574_s16 = scalar_lea.sflag [#allocation13], %s1405_s3  ;;  %s612_s13 = int_to_ptr.hbm [resolvable:$true] %s611_s13 }
  0x4b   : > { %v557_v43 = vmul.f32 %v543_v5, %v473_v16  ;;  %v521_v51 = vmul.f32 %v1433_v3, %v473_v16  ;;  %s1116_s18 = sshra.s32 %s612_s13, 4  ;;  %s1122_s27 = scalar_lea.hbm %s1548_s6, 32  ;;  %s1117_s18 = int_to_ptr.hbm [resolvable:$true] %s1116_s18 }
  0x4c   : > { %s1118_s8 = scalar_lea.hbm %s1117_s18, 16  ;;  %p1123_p7 = scmp.lt.s32.totalorder %s1117_s18, %s1548_s6 }
  0x4d   : > { %496 = vrot.lane.b32.xlu1 %v1433_v3, %s1229_s1  ;;  %492 = vrot.lane.b32.xlu0 %v488_v4, %s1229_s1  ;;  %p1119_p4 = scmp.ne.s32.totalorder %s1117_s18, %s1118_s8  ;;  %p1124_p8 = scmp.lt.s32.totalorder %s1122_s27, %s1118_s8 }
  0x4e   : > { %s588_s5 = scalar_lea.hbm %s1578_s7, %s855_s26 }
  0x4f   : > { %546 = vrot.lane.b32.xlu2 %v543_v5, %s1229_s1  ;;  %s591_s14 = sshll.u32 %s588_s5, 4  ;;  %p1120_p5 = pnand %p1119_p4, %p1324_p9  ;;  %s1490_s14 = int_to_ptr.hbm [resolvable:$true] %s591_s14 }
  0x50   : > { %p1125_p10 = por %p1124_p8, %p1123_p7 }
  0x51   : > { %p1121_p6 = pneg %p1120_p5 }
  0x53   : > { %p1126_p13 = pnand %p1125_p10, %p1121_p6 }
  0x55   : > { %507 = vrot.lane.b32.xlu1 %v488_v4, %s1230_s9  ;;  %505 = vrot.lane.b32.xlu0 %v486_v1, %s1230_s9 }
  0x57   : > { %509 = vrot.lane.b32.xlu2 %v487_v0, %s1230_s9 }
  0x5d   : > { %550 = vrot.lane.b32.xlu1 %v542_v2, %s1230_s9  ;;  %511 = vrot.lane.b32.xlu0 %v1433_v3, %s1230_s9 }
  0x5f   : > { %552 = vrot.lane.b32.xlu2 %v543_v5, %s1230_s9 }
  0xa1   : > { %v545_v6 = vpop.permute.xlu2 %544 }
  0xa9   : > { %v547_v11 = vpop.permute.xlu2 %546 }
  0xaa   : > { %v548_v30 = vsel %vm500_vm0, %v545_v6, %v547_v11  ;;  %v549_v31 = vsel %vm500_vm0, %v547_v11, %v545_v6 }
  0xab   : > { %v558_v44 = vmul.f32 %v548_v30, %v477_v18  ;;  %v559_v45 = vmul.f32 %v549_v31, %v478_v19 }
  0xad   : > { %v560_v53 = vadd.f32 %v558_v44, %v556_v42  ;;  %v561_v54 = vadd.f32 %v559_v45, %v557_v43 }
  0xb1   : > { %v510_v23 = vpop.permute.xlu2 %509 }
  0xb7   : > { %v495_v8 = vpop.permute.xlu1 %494  ;;  %v491_v9 = vpop.permute.xlu0 %490 }
  0xb8   : > { %v501_v20 = vsel %vm500_vm0, %v491_v9, %v495_v8  ;;  %v503_v21 = vsel %vm500_vm0, %v495_v8, %v491_v9 }
  0xb9   : > { %v522_v26 = vmul.f32 %v501_v20, %v477_v18  ;;  %v523_v27 = vmul.f32 %v503_v21, %v478_v19  ;;  %v553_v50 = vpop.permute.xlu2 %552 }
  0xbb   : > { %v526_v38 = vadd.f32 %v522_v26, %v518_v25  ;;  %v527_v39 = vadd.f32 %v523_v27, %v519_v24 }
  0xbf   : > { %v497_v14 = vpop.permute.xlu1 %496  ;;  %v493_v15 = vpop.permute.xlu0 %492 }
  0xc0   : > { %v502_v35 = vsel %vm500_vm0, %v493_v15, %v497_v14  ;;  %v504_v46 = vsel %vm500_vm0, %v497_v14, %v493_v15 }
  0xc1   : > { %v524_v47 = vmul.f32 %v502_v35, %v477_v18  ;;  %v525_v52 = vmul.f32 %v504_v46, %v478_v19 }
  0xc3   : > { %v528_v55 = vadd.f32 %v524_v47, %v520_v34  ;;  %v529_v2 = vadd.f32 %v525_v52, %v521_v51 }
  0xc7   : > { %v508_v32 = vpop.permute.xlu1 %507  ;;  %v506_v33 = vpop.permute.xlu0 %505 }
  0xc8   : > { %v514_v36 = vsel %vm513_vm1, %v506_v33, %v510_v23  ;;  %v516_v37 = vsel %vm513_vm1, %v510_v23, %v506_v33 }
  0xc9   : > { %v530_v40 = vmul.f32 %v516_v37, %v482_v28  ;;  %v531_v41 = vmul.f32 %v514_v36, %v483_v29 }
  0xcb   : > { %v534_v48 = vadd.f32 %v530_v40, %v526_v38  ;;  %v535_v49 = vadd.f32 %v531_v41, %v527_v39 }
  0xcd   : > { %538 = vst [vmem:[%s1466_s10] sm:$0xff] %v534_v48 }
  0xce   : > { %539 = vst [vmem:[%s1466_s10 + $0x8] sm:$0xff] %v535_v49 }
  0xcf   : > { %v551_v56 = vpop.permute.xlu1 %550  ;;  %v512_v57 = vpop.permute.xlu0 %511 }
  0xd0   : > { %v554_v58 = vsel %vm513_vm1, %v551_v56, %v553_v50  ;;  %v555_v59 = vsel %vm513_vm1, %v553_v50, %v551_v56  ;;  %v515_v60 = vsel %vm513_vm1, %v508_v32, %v512_v57  ;;  %v517_v61 = vsel %vm513_vm1, %v512_v57, %v508_v32 }
  0xd1   : > { %v562_v62 = vmul.f32 %v555_v59, %v482_v28  ;;  %v563_v63 = vmul.f32 %v554_v58, %v483_v29  ;;  %v532_v0 = vmul.f32 %v517_v61, %v482_v28  ;;  %v533_v1 = vmul.f32 %v515_v60, %v483_v29 }
  0xd3   : > { %v564_v3 = vadd.f32 %v562_v62, %v560_v53  ;;  %v565_v4 = vadd.f32 %v563_v63, %v561_v54  ;;  %v536_v5 = vadd.f32 %v532_v0, %v528_v55  ;;  %v537_v6 = vadd.f32 %v533_v1, %v529_v2 }
  0xd5   : > { %566 = vst [vmem:[%s458_s20] sm:$0xff] %v564_v3 }
  0xd6   : > { %567 = vst [vmem:[%s458_s20 + $0x8] sm:$0xff] %v565_v4 }
  0xd7   : > { %540 = vst [vmem:[%s1466_s10 + $0x10] sm:$0xff] %v536_v5 }
  0xd8   : > { %1129 = shalt.err (!%p1126_p13)
}
  0xd9   : > { %868 = dma.vmem_to_hbm [thread:$0]  (%p1324_p9), %s610_s23, 256, %s612_s13, %s574_s16   ;;  %541 = vst [vmem:[%s1466_s10 + $0x18] sm:$0xff] %v537_v6 }
  0xda   : > { %s569_s9 = scalar_lea.sflag [#allocation4], %s1405_s3  ;;  %s1144_s26 = sshra.s32 %s1490_s14, 4  ;;  %s1145_s26 = int_to_ptr.hbm [resolvable:$true] %s1144_s26 }
  0xdb   : > { %s1146_s12 = scalar_lea.hbm %s1145_s26, 32  ;;  %s1150_s20 = scalar_lea.hbm %s1578_s7, 64 }
  0xdc   : > { %p1147_p0 = scmp.ne.s32.totalorder %s1145_s26, %s1146_s12  ;;  %p1151_p3 = scmp.lt.s32.totalorder %s1145_s26, %s1578_s7 }
  0xdd   : > { %p1152_p4 = scmp.lt.s32.totalorder %s1150_s20, %s1146_s12 }
  0xde   : > { %p1148_p1 = pnand %p1147_p0, %p1324_p9 }
  0xdf   : > { %p1153_p5 = por %p1152_p4, %p1151_p3 }
  0xe0   : > { %p1149_p2 = pneg %p1148_p1 }
  0xe2   : > { %p1154_p6 = pnand %p1153_p5, %p1149_p2 }
  0xe4   : > { %1157 = shalt.err (!%p1154_p6)
}
  0xe5   : > { %s1231_s3 = smov 256   ;;  %s1232_s10 = smov 512  }
  0xe6   : > { %s1233_s23 = smov 16  }
  0xe7   : > { %867 = dma.vmem_to_hbm [thread:$0]  (%p1324_p9), %s1488_s29, 512, %s1490_s14, %s569_s9, %s1231_s3, %s1232_s10, %s1233_s23  }
  0xe8 PF: > { %s1580_s5 = sld [smem:[#allocation19_spill]]  ;;  %p888_p7 = pnand %p824_p12, %p1331_p11 }
  0xe9   : > { %s1582_s16 = sld [smem:[#allocation21_spill]] }
  0xea   : > { %p889_p8 = pneg %p888_p7 }
  0xee   : > { %s623_s18 = sand.u32 1, %s1580_s5  }
  0xef   : > { %s624_s8 = scalar_lea.sflag [#allocation4], %s623_s18 }
  0xf0   : > { %1195 = dma.done.wait (%p889_p8), %s624_s8, 512  }
  0xf1   : > { %1197 = vsyncadd (%p889_p8), %s624_s8, 4294966784  ;;  %s634_s30 = scalar_lea.sflag [#allocation13], %s623_s18 }
  0xf2   : > { %1199 = dma.done.wait (%p889_p8), %s634_s30, 256  }
  0xf3   : > { %1201 = vsyncadd (%p889_p8), %s634_s30, 4294967040  ;;  %s32_s26 = sadd.s32 1, %s1582_s16   ;;  %s1583_s29 = sld [smem:[#allocation20_spill]] }
  0xf4   : > { %p29_p10 = scmp.ge.s32.totalorder %s32_s26, 4   ;;  %s1584_s23 = sld [smem:[#allocation24_spill]] }
  0xf5   : > { %s1585_s14 = sld [smem:[#allocation22_spill]]  ;;  %s1586_s21 = smov %s1208_s22 }
  0xf6   : > { %s1588_s24 = smov %s1220_s25 }
  0xf7   :  { %31 = sbr.rel (!%p29_p10) target bundleno = 16 (0x10), region = 150 }
  0xf9   : > { %s1587_s22 = smov %s1583_s29 }
  0xfb   : > { %s1589_s25 = smov %s1585_s14 }
  0xfc   :  { %640 = vsyncpa [#allocation3], 1 }
  0xfd   :  { %642 = vsyncpa [#allocation3 + $0x1], 1 }
  0xfe   :  { %643 = vsyncpa [#allocation6], 1 }
  0xff   :  { %645 = vsyncpa [#allocation6 + $0x1], 1 }
 0x100   :  { %646 = vsyncpa [#allocation9], 1 }
 0x101   :  { %648 = vsyncpa [#allocation9 + $0x1], 1 }
 0x102   :  { %649 = vsyncpa [#allocation4], 1 }
 0x103   :  { %651 = vsyncpa [#allocation4 + $0x1], 1 }
 0x104   :  { %652 = vsyncpa [#allocation13], 1 }
 0x105   :  { %654 = vsyncpa [#allocation13 + $0x1], 1 }

</bundles_post_ra>
